<compile_context>
chip_gen: v6e
topology: v6e:2x2x1
jax: 0.10.0
libtpu: 0.0.40
codegen_flags: <defaults>
</compile_context>

<pallas_src>
import functools

import jax
import jax.numpy as jnp
from jax.experimental import pallas as pl
from jax.experimental.pallas import tpu as pltpu

_EPS = 1e-07
_NEG_BIG = -1e30  # "minus infinity" for masking the positive entry


def _pick_tile(total, candidates):
    for c in candidates:
        if c <= total and total % c == 0:
            return c
    return total


# ---------------------------------------------------------------------------
# Kernel 1: similarities = l2_normalize(points) @ memory_bank.T
# ---------------------------------------------------------------------------
def _sim_kernel(points_ref, bank_ref, sim_ref, pn_ref):
    # Hoisted L2 normalization: done once per core (inner grid index 0) into
    # VMEM scratch; every bank tile re-uses it (no per-tile sqrt/divide).
    @pl.when(pl.program_id(1) == 0)
    def _():
        p = points_ref[...].astype(jnp.float32)
        norm = jnp.sqrt(jnp.sum(p * p, axis=1, keepdims=True))
        pn_ref[...] = p / norm

    # Contract on the last dims -> feeds the MXU directly, no explicit .T of
    # the (tn, D) bank tile.
    sim_ref[...] = jax.lax.dot_general(
        pn_ref[...],
        bank_ref[...].astype(jnp.float32),
        dimension_numbers=(((1,), (1,)), ((), ())),
        preferred_element_type=jnp.float32,
    )


def _similarities(points, memory_bank, *, tn=None):
    B, D = points.shape
    N, D2 = memory_bank.shape
    assert D == D2
    if tn is None:
        # Big lane-dense bank tiles: this kernel is HBM-bound on the bank
        # stream, so prefer 512+ when N allows (sweepable via the tn arg).
        tn = _pick_tile(N, (2048, 1024, 512, 256, 128))
    assert N % tn == 0
    n_tiles = N // tn
    # Outer parallel axis of size 2 lets v7x split the bank sweep over its two
    # TensorCores; the inner "arbitrary" axis preserves the scratch dependency.
    n_outer = 2 if (n_tiles % 2 == 0 and n_tiles >= 2) else 1
    n_inner = n_tiles // n_outer

    cost = pl.CostEstimate(
        flops=2 * B * N * D,
        transcendentals=B,
        bytes_accessed=4 * (B * D + N * D + B * N),
    )

    return pl.pallas_call(
        _sim_kernel,
        out_shape=jax.ShapeDtypeStruct((B, N), jnp.float32),
        grid=(n_outer, n_inner),
        in_specs=[
            pl.BlockSpec((B, D), lambda o, i: (0, 0)),
            pl.BlockSpec((tn, D), lambda o, i, ni=n_inner: (o * ni + i, 0)),
        ],
        out_specs=pl.BlockSpec((B, tn), lambda o, i, ni=n_inner: (0, o * ni + i)),
        scratch_shapes=[pltpu.VMEM((B, D), jnp.float32)],
        compiler_params=pltpu.CompilerParams(
            dimension_semantics=("parallel", "arbitrary")),
        cost_estimate=cost,
    )(points, memory_bank)


# ---------------------------------------------------------------------------
# Kernel 2: entropy binary search + loss terms, tiled over batch rows
# ---------------------------------------------------------------------------
def _entropy_loss_kernel(sim_ref, idx_ref, logpos_ref, centers_ref, ent_ref,
                         *, target_entropy, iterations):
    sim = sim_ref[...].astype(jnp.float32)               # (tb, N)
    tb, n = sim.shape
    col = jax.lax.broadcasted_iota(jnp.int32, (tb, n), 1)
    pos_mask = col == idx_ref[...]                       # one-hot of positives

    def masked_entropy(centers):
        # torch: F = exp(sim/t); F[pos] = 0; r = F / F.sum(); H = -sum r*log(r+eps)
        # Row-max subtraction cancels in the ratio -> identical math, but stable.
        s = sim / centers
        s = jnp.where(pos_mask, jnp.float32(_NEG_BIG), s)
        m = jnp.max(s, axis=1, keepdims=True)
        f = jnp.exp(s - m)                               # positive entry -> 0
        r = f / jnp.sum(f, axis=1, keepdims=True)
        return -jnp.sum(r * jnp.log(r + _EPS), axis=1, keepdims=True)

    # 13-step binary search for the per-row temperature.  Unrolled Python loop:
    # short fixed trip count, `scale` stays a compile-time constant.
    centers = jnp.full((tb, 1), 5.0, dtype=jnp.float32)
    scale = 2.5
    for _ in range(iterations):
        ent = masked_entropy(centers)
        indication = 2.0 * (ent < target_entropy).astype(jnp.float32) - 1.0
        centers = centers + jnp.float32(scale) * indication
        scale *= 0.5

    ent = masked_entropy(centers)

    # distribution = softmax(sim / centers) over the bank axis (positive entry
    # included); gather its positive probability via the same one-hot mask.
    s = sim / centers
    m = jnp.max(s, axis=1, keepdims=True)
    e = jnp.exp(s - m)
    z = jnp.sum(e, axis=1, keepdims=True)
    pos_e = jnp.sum(jnp.where(pos_mask, e, 0.0), axis=1, keepdims=True)
    pos_prob = pos_e / z

    logpos_ref[...] = jnp.log(pos_prob + _EPS)
    centers_ref[...] = centers
    ent_ref[...] = ent


def fixed_entropy_point_loss(points, point_indices, memory_bank,
                             target_entropy, *, iterations=13,
                             tn=None, tb=None):
    """Pallas implementation of FixedEntropyPointLoss.forward.

    Returns (loss, similarities, centers_mean, entropy_mean); the two means are
    returned as JAX scalars (the torch module calls .item() on them).
    """
    B, D = points.shape
    N, _ = memory_bank.shape

    similarities = _similarities(points, memory_bank, tn=tn)

    if tb is None:
        tb = _pick_tile(B, (256, 128, 64, 32, 16, 8))
    assert B % tb == 0

    idx2d = point_indices.astype(jnp.int32).reshape(B, 1)
    kernel = functools.partial(
        _entropy_loss_kernel,
        target_entropy=float(target_entropy),
        iterations=int(iterations),
    )

    cost = pl.CostEstimate(
        flops=(iterations + 2) * 8 * B * N,
        transcendentals=(iterations + 2) * 2 * B * N,
        bytes_accessed=4 * (B * N + 4 * B),
    )

    row_spec = pl.BlockSpec((tb, 1), lambda i: (i, 0))
    logpos, centers, entropy = pl.pallas_call(
        kernel,
        out_shape=(
            jax.ShapeDtypeStruct((B, 1), jnp.float32),   # log(pos_prob + eps)
            jax.ShapeDtypeStruct((B, 1), jnp.float32),   # centers (temperature)
            jax.ShapeDtypeStruct((B, 1), jnp.float32),   # entropy at centers
        ),
        grid=(B // tb,),
        in_specs=[
            pl.BlockSpec((tb, N), lambda i: (i, 0)),
            pl.BlockSpec((tb, 1), lambda i: (i, 0)),
        ],
        out_specs=(row_spec, row_spec, row_spec),
        compiler_params=pltpu.CompilerParams(
            dimension_semantics=("parallel",)),
        cost_estimate=cost,
    )(similarities, idx2d)

    loss = -jnp.mean(logpos)
    return loss, similarities, jnp.mean(centers), jnp.mean(entropy)


# ---------------------------------------------------------------------------
# Pure-JAX reference for correctness checks
# ---------------------------------------------------------------------------
def _reference_loss(sims, point_indices, target_entropy, iterations=13):
    B, N = sims.shape
    pos_mask = jnp.arange(N)[None, :] == point_indices[:, None]

    def calc_ent(centers):
        s = sims / centers[:, None]
        s = jnp.where(pos_mask, _NEG_BIG, s)
        m = jnp.max(s, axis=1, keepdims=True)
        f = jnp.exp(s - m)
        r = f / jnp.sum(f, axis=1, keepdims=True)
        return -jnp.sum(r * jnp.log(r + _EPS), axis=1)

    centers = jnp.full((B,), 5.0, jnp.float32)
    scale = 2.5
    for _ in range(iterations):
        ent = calc_ent(centers)
        indication = 2.0 * (ent < target_entropy).astype(jnp.float32) - 1.0
        centers = centers + scale * indication
        scale *= 0.5
    ent = calc_ent(centers)
    dist = jax.nn.softmax(sims / centers[:, None], axis=1)
    pos = dist[jnp.arange(B), point_indices]
    loss = -jnp.mean(jnp.log(pos + _EPS))
    return loss, jnp.mean(centers), jnp.mean(ent)


def _reference(points, point_indices, memory_bank, target_entropy, iterations=13):
    p = points.astype(jnp.float32)
    pn = p / jnp.sqrt(jnp.sum(p * p, axis=1, keepdims=True))
    sims = pn @ memory_bank.astype(jnp.float32).T
    loss, c_mean, e_mean = _reference_loss(sims, point_indices,
                                           target_entropy, iterations)
    return loss, sims, c_mean, e_mean


if __name__ == "__main__":
    key = jax.random.PRNGKey(0)
    kp, kb, ki = jax.random.split(key, 3)

    B, D, N = 8, 32, 256          # batch, feature dim, memory-bank size
    target_entropy = 4.5          # < log(N-1) ~= 5.54 so the search converges

    points = jax.random.normal(kp, (B, D), dtype=jnp.float32)
    memory_bank = jax.random.normal(kb, (N, D), dtype=jnp.float32)
    # the memory bank in the original code stores l2-normalized entries
    memory_bank = memory_bank / jnp.sqrt(
        jnp.sum(memory_bank ** 2, axis=1, keepdims=True))
    point_indices = jax.random.randint(ki, (B,), 0, N, dtype=jnp.int32)

    loss, sims, c_mean, e_mean = fixed_entropy_point_loss(
        points, point_indices, memory_bank, target_entropy)
    loss = jax.block_until_ready(loss)
    sims = jax.block_until_ready(sims)
    c_mean = jax.block_until_ready(c_mean)
    e_mean = jax.block_until_ready(e_mean)

    # 1) similarities vs a pure-JAX matmul reference
    _, ref_sims, _, _ = _reference(points, point_indices, memory_bank,
                                   target_entropy)
    assert jnp.allclose(sims, ref_sims, atol=1e-4, rtol=1e-4), "sims mismatch"

    # 2) loss / centers / entropy vs the reference search run on the kernel's
    #    own similarities (avoids flaky binary-search threshold flips caused by
    #    matmul rounding differences).
    ref_loss, ref_c, ref_e = _reference_loss(sims, point_indices, target_entropy)
    assert jnp.allclose(loss, ref_loss, atol=1e-3, rtol=1e-3), "loss mismatch"
    assert jnp.allclose(c_mean, ref_c, atol=5e-3, rtol=1e-3), "centers mismatch"
    assert jnp.allclose(e_mean, ref_e, atol=5e-3, rtol=1e-3), "entropy mismatch"

    print("KERNEL_OK")
</pallas_src>

<mosaic_0001>
module attributes {stable_mosaic.version = 11 : i64} {
  func.func @_sim_kernel(%arg0: i32, %arg1: i32, %arg2: memref<8x32xf32, #tpu.memory_space<vmem>>, %arg3: memref<256x32xf32, #tpu.memory_space<vmem>>, %arg4: memref<8x256xf32, #tpu.memory_space<vmem>>, %arg5: memref<8x32xf32, #tpu.memory_space<vmem>>) attributes {dimension_semantics = [#tpu.dimension_semantics<parallel>, #tpu.dimension_semantics<arbitrary>], iteration_bounds = array<i64: 1, 1>, scalar_prefetch = 0 : i64, scratch_operands = 1 : i64, tpu.core_type = #tpu.core_type<tc>, window_params = [{pipeline_mode = #tpu.pipeline_mode<synchronous>, transform_indices = @transform_0, window_bounds = array<i64: 8, 32>}, {transform_indices = @transform_1, window_bounds = array<i64: 256, 32>}, {transform_indices = @transform_2, window_bounds = array<i64: 8, 256>}]} {
    %c0_i32 = arith.constant 0 : i32
    %0 = arith.cmpi eq, %arg1, %c0_i32 : i32
    %1 = arith.extui %0 : i1 to i32
    %c0_i32_0 = arith.constant 0 : i32
    %2 = arith.cmpi ne, %1, %c0_i32_0 : i32
    scf.if %2 {
      %c0_6 = arith.constant 0 : index
      %c0_7 = arith.constant 0 : index
      %7 = vector.load %arg2[%c0_6, %c0_7] : memref<8x32xf32, #tpu.memory_space<vmem>>, vector<8x32xf32>
      %8 = arith.mulf %7, %7 : vector<8x32xf32>
      %cst_8 = arith.constant dense<0.000000e+00> : vector<8xf32>
      %9 = vector.multi_reduction <add>, %8, %cst_8 [1] : vector<8x32xf32> to vector<8xf32>
      %10 = vector.shape_cast %9 : vector<8xf32> to vector<8x1xf32>
      %11 = math.sqrt %10 : vector<8x1xf32>
      %12 = vector.broadcast %11 : vector<8x1xf32> to vector<8x32xf32>
      %13 = arith.divf %7, %12 : vector<8x32xf32>
      %c0_9 = arith.constant 0 : index
      %c0_10 = arith.constant 0 : index
      %14 = vector.load %arg5[%c0_9, %c0_10] : memref<8x32xf32, #tpu.memory_space<vmem>>, vector<8x32xf32>
      tpu.vector_store %arg5[%c0_9, %c0_10], %13 {strides = array<i32>} : memref<8x32xf32, #tpu.memory_space<vmem>>, vector<8x32xf32>,
    } else {
    }
    %c0 = arith.constant 0 : index
    %c0_1 = arith.constant 0 : index
    %3 = vector.load %arg5[%c0, %c0_1] : memref<8x32xf32, #tpu.memory_space<vmem>>, vector<8x32xf32>
    %c0_2 = arith.constant 0 : index
    %c0_3 = arith.constant 0 : index
    %4 = vector.load %arg3[%c0_2, %c0_3] : memref<256x32xf32, #tpu.memory_space<vmem>>, vector<256x32xf32>
    %cst = arith.constant dense<0.000000e+00> : vector<8x256xf32>
    %5 = tpu.matmul %3, %4, %cst {dimension_numbers = #tpu.dot_dimension_numbers<[1], [1], [0], [0], [0, 0, 1, 0], [], []>} : vector<8x32xf32>, vector<256x32xf32>, vector<8x256xf32> -> vector<8x256xf32>
    %c0_4 = arith.constant 0 : index
    %c0_5 = arith.constant 0 : index
    %6 = vector.load %arg4[%c0_4, %c0_5] : memref<8x256xf32, #tpu.memory_space<vmem>>, vector<8x256xf32>
    tpu.vector_store %arg4[%c0_4, %c0_5], %5 {strides = array<i32>} : memref<8x256xf32, #tpu.memory_space<vmem>>, vector<8x256xf32>,
    return
  }
  func.func @transform_0(%arg0: i32, %arg1: i32) -> (i32, i32) {
    %c0_i32 = arith.constant 0 : i32
    %c0_i32_0 = arith.constant 0 : i32
    %c0_i32_1 = arith.constant 0 : i32
    return %c0_i32, %c0_i32_0 : i32, i32
  }
  func.func @transform_1(%arg0: i32, %arg1: i32) -> (i32, i32) {
    %c1_i32 = arith.constant 1 : i32
    %0 = arith.muli %arg0, %c1_i32 : i32
    %1 = arith.addi %0, %arg1 : i32
    %c0_i32 = arith.constant 0 : i32
    %c0_i32_0 = arith.constant 0 : i32
    return %1, %c0_i32 : i32, i32
  }
  func.func @transform_2(%arg0: i32, %arg1: i32) -> (i32, i32) {
    %c1_i32 = arith.constant 1 : i32
    %0 = arith.muli %arg0, %c1_i32 : i32
    %1 = arith.addi %0, %arg1 : i32
    %c0_i32 = arith.constant 0 : i32
    %c0_i32_0 = arith.constant 0 : i32
    return %c0_i32, %1 : i32, i32
  }
}

</mosaic_0001>

<bundles_post_ra>
// kernel: tpu_custom_call.1
= control target key start
LH: loop header
LB: loop body
LE: loop exit
PB: predicated region body
PF: predicated region fallthrough
CT: control target
= control target key end

     0   :  { %vm42_vm0 = vcmask 261120   ;;  %s539_s0 = inlined_call_operand.vmem [shape: f32[8,32], index: 0, kind: input, shape index: {}]   ;;  %s540_s1 = inlined_call_operand.vmem [shape: f32[256,32], index: 1, kind: input, shape index: {}]   ;;  %s541_s2 = inlined_call_operand.hbm [shape: f32[8,256], index: 2, kind: output, shape index: {}]  }
   0x1   :  { %v399_v0 = vld [vmem:[%s539_s0] sm:$0xff]  ;;  %v88_v1 = vld [vmem:[%s540_s1 + $0xf8] sm:$0xff]  ;;  %v87_v4 = vld [vmem:[%s540_s1 + $0xf0] sm:$0xff] }
   0x2   :  { %v72_v2 = vld [vmem:[%s540_s1 + $0x78] sm:$0xff]  ;;  %v41_v3 = vmul.f32 %v399_v0, %v399_v0  ;;  %319 = vmatprep.subr.msk.mxu0 %vm42_vm0, %v88_v1  ;;  %v71_v6 = vld [vmem:[%s540_s1 + $0x70] sm:$0xff] }
   0x3   :  { %320 = vmatpush3.xpose.msk.msra.mxu0 %vm42_vm0, %v72_v2 }
   0x4   :  { %v43_v5 = vsel %vm42_vm0, %v41_v3, 0.0  ;;  %321 = vmatprep.subr.msk.mxu0 %vm42_vm0, %v87_v4 }
   0x5   :  { %7 = vsyncpa [#allocation4], 0  ;;  %44 = vadd.xlane.f32.xlu0 %v43_v5  ;;  %v86_v7 = vld [vmem:[%s540_s1 + $0xe8] sm:$0xff]  ;;  %v85_v9 = vld [vmem:[%s540_s1 + $0xe0] sm:$0xff] }
   0x6   :  { %v70_v8 = vld [vmem:[%s540_s1 + $0x68] sm:$0xff]  ;;  %v69_v10 = vld [vmem:[%s540_s1 + $0x60] sm:$0xff]  ;;  %v84_v11 = vld [vmem:[%s540_s1 + $0xd8] sm:$0xff] }
   0x7   :  { %322 = vmatpush3.xpose.msk.msra.mxu0 %vm42_vm0, %v71_v6  ;;  %v68_v12 = vld [vmem:[%s540_s1 + $0x58] sm:$0xff]  ;;  %v83_v13 = vld [vmem:[%s540_s1 + $0xd0] sm:$0xff]  ;;  %v82_v15 = vld [vmem:[%s540_s1 + $0xc8] sm:$0xff] }
   0x8   :  { %323 = vmatprep.subr.msk.mxu0 %vm42_vm0, %v86_v7  ;;  %v67_v14 = vld [vmem:[%s540_s1 + $0x50] sm:$0xff]  ;;  %v66_v16 = vld [vmem:[%s540_s1 + $0x48] sm:$0xff]  ;;  %v81_v17 = vld [vmem:[%s540_s1 + $0xc0] sm:$0xff] }
   0x9   :  { %v65_v18 = vld [vmem:[%s540_s1 + $0x40] sm:$0xff]  ;;  %v80_v19 = vld [vmem:[%s540_s1 + $0xb8] sm:$0xff]  ;;  %v79_v21 = vld [vmem:[%s540_s1 + $0xb0] sm:$0xff] }
   0xa   :  { %v64_v20 = vld [vmem:[%s540_s1 + $0x38] sm:$0xff]  ;;  %v63_v22 = vld [vmem:[%s540_s1 + $0x30] sm:$0xff]  ;;  %v78_v23 = vld [vmem:[%s540_s1 + $0xa8] sm:$0xff] }
   0xb   :  { %324 = vmatpush3.xpose.msk.msra.mxu0 %vm42_vm0, %v70_v8  ;;  %v62_v24 = vld [vmem:[%s540_s1 + $0x28] sm:$0xff]  ;;  %v77_v25 = vld [vmem:[%s540_s1 + $0xa0] sm:$0xff]  ;;  %v76_v27 = vld [vmem:[%s540_s1 + $0x98] sm:$0xff] }
   0xc   :  { %325 = vmatprep.subr.msk.mxu0 %vm42_vm0, %v85_v9  ;;  %v61_v26 = vld [vmem:[%s540_s1 + $0x20] sm:$0xff]  ;;  %v60_v28 = vld [vmem:[%s540_s1 + $0x18] sm:$0xff]  ;;  %v75_v29 = vld [vmem:[%s540_s1 + $0x90] sm:$0xff] }
   0xd   :  { %v59_v30 = vld [vmem:[%s540_s1 + $0x10] sm:$0xff]  ;;  %v74_v31 = vld [vmem:[%s540_s1 + $0x88] sm:$0xff]  ;;  %v73_v33 = vld [vmem:[%s540_s1 + $0x80] sm:$0xff] }
   0xe   :  { %v58_v32 = vld [vmem:[%s540_s1 + $0x8] sm:$0xff]  ;;  %v57_v34 = vld [vmem:[%s540_s1] sm:$0xff]  ;;  %s380_s1 = smov [#allocation3]  }
   0xf   :  { %326 = vmatpush3.xpose.msk.msra.mxu0 %vm42_vm0, %v69_v10  ;;  %s272_s0 = sshll.u32 %s380_s1, 4  ;;  %s273_s0 = int_to_ptr.vmem [resolvable:$true] %s272_s0 }
  0x10   :  { %327 = vmatprep.subr.msk.mxu0 %vm42_vm0, %v84_v11  ;;  %s358_s17 = scalar_lea.vmem %s273_s0, 256  ;;  %p363_p1 = scmp.lt.s32.totalorder %s273_s0, %s273_s0 }
  0x11   :  { %p359_p0 = scmp.ne.s32.totalorder %s273_s0, %s358_s17  ;;  %p364_p2 = scmp.lt.s32.totalorder %s358_s17, %s358_s17 }
  0x13   :  { %328 = vmatpush3.xpose.msk.msra.mxu0 %vm42_vm0, %v68_v12  ;;  %p365_p3 = por %p364_p2, %p363_p1 }
  0x14   :  { %329 = vmatprep.subr.msk.mxu0 %vm42_vm0, %v83_v13 }
  0x15   :  { %p366_p4 = pnand %p365_p3, %p359_p0 }
  0x17   :  { %330 = vmatpush3.xpose.msk.msra.mxu0 %vm42_vm0, %v67_v14 }
  0x18   :  { %331 = vmatprep.subr.msk.mxu0 %vm42_vm0, %v82_v15 }
  0x1b   :  { %332 = vmatpush3.xpose.msk.msra.mxu0 %vm42_vm0, %v66_v16 }
  0x1c   :  { %333 = vmatprep.subr.msk.mxu0 %vm42_vm0, %v81_v17 }
  0x1f   :  { %334 = vmatpush3.xpose.msk.msra.mxu0 %vm42_vm0, %v65_v18 }
  0x20   :  { %335 = vmatprep.subr.msk.mxu0 %vm42_vm0, %v80_v19 }
  0x23   :  { %336 = vmatpush3.xpose.msk.msra.mxu0 %vm42_vm0, %v64_v20 }
  0x24   :  { %337 = vmatprep.subr.msk.mxu0 %vm42_vm0, %v79_v21 }
  0x27   :  { %338 = vmatpush3.xpose.msk.msra.mxu0 %vm42_vm0, %v63_v22 }
  0x28   :  { %339 = vmatprep.subr.msk.mxu0 %vm42_vm0, %v78_v23 }
  0x2b   :  { %340 = vmatpush3.xpose.msk.msra.mxu0 %vm42_vm0, %v62_v24 }
  0x2c   :  { %341 = vmatprep.subr.msk.mxu0 %vm42_vm0, %v77_v25 }
  0x2f   :  { %342 = vmatpush3.xpose.msk.msra.mxu0 %vm42_vm0, %v61_v26 }
  0x30   :  { %343 = vmatprep.subr.msk.mxu0 %vm42_vm0, %v76_v27 }
  0x33   :  { %344 = vmatpush3.xpose.msk.msra.mxu0 %vm42_vm0, %v60_v28 }
  0x34   :  { %345 = vmatprep.subr.msk.mxu0 %vm42_vm0, %v75_v29 }
  0x37   :  { %346 = vmatpush3.xpose.msk.msra.mxu0 %vm42_vm0, %v59_v30 }
  0x38   :  { %347 = vmatprep.subr.msk.mxu0 %vm42_vm0, %v74_v31 }
  0x3b   :  { %348 = vmatpush3.xpose.msk.msra.mxu0 %vm42_vm0, %v58_v32 }
  0x3c   :  { %349 = vmatprep.subr.msk.mxu0 %vm42_vm0, %v73_v33 }
  0x3f   :  { %350 = vmatpush3.xpose.msk.msra.mxu0 %vm42_vm0, %v57_v34 }
  0x8e   :  { %v45_v35 = vpop.xlane.xlu0 %44 }
  0x8f   :  { %354 = vrsqrt.f32 %v45_v35  ;;  %vm48_vm1 = vcmp.eq.f32.partialorder %v45_v35, inf  ;;  %v51_v38 = vand.u32 2147483648, %v45_v35  ;;  %vm50_vm2 = vcmp.eq.f32.partialorder %v45_v35, 0.0 }
  0x9c   :  { %v355_v36 = vpop.eup %354 }
  0x9d   :  { %v47_v37 = vmul.f32 %v355_v36, %v45_v35 }
  0x9f   :  { %v49_v39 = vsel %vm48_vm1, %v45_v35, %v47_v37 }
  0xa0   :  { %v52_v40 = vsel %vm50_vm2, %v51_v38, %v49_v39 }
  0xa1   :  { %356 = vrcp.f32 %v52_v40 }
  0xae   :  { %v357_v41 = vpop.eup %356 }
  0xaf   :  { %v54_v42 = vmul.f32 %v357_v41, %v399_v0 }
  0xb1   :  { %55 = vst.msk [vmem:[#allocation2] sm:$0xff] %vm42_vm0, %v54_v42 }
  0xb8   :  { %v56_v43 = vld [vmem:[#allocation2] sm:$0xff] }
  0xb9   :  { %351 = vmatprep.mubr.msk.f32.mxu0 %vm42_vm0, %v56_v43 }
  0xba   :  { %352 = vmatmul.mubr.msk.f32.vlgmr.msra.gmra.mxu0 %vm42_vm0, %v56_v43 }
 0x17a   :  { %v255_v44 = vpop.f32.mrf.mxu0 }
 0x17b   :  { %260 = vst [vmem:[#allocation3] sm:$0xff] %v255_v44 }
 0x17c   :  { %v257_v45 = vpop.f32.mrf.mxu0 }
 0x17d   :  { %261 = vst [vmem:[#allocation3 + $0x8] sm:$0xff] %v257_v45 }
 0x17e   :  { %369 = shalt.err (!%p366_p4)
}
 0x17f   :  { %275 = dma.vmem_to_hbm [thread:$0]  %s273_s0, 256, %s541_s2, [#allocation4]  }
 0x180   :  { %378 = dma.done.wait [#allocation4], 256  }
 0x181   :  { %379 = vsyncadd [#allocation4], 4294967040 }
 0x182   :  { %279 = vsyncpa [#allocation4], 1 }

</bundles_post_ra>
